<compile_context>
chip_gen: v6e
topology: v6e:2x2x1
jax: 0.10.0
libtpu: 0.0.40
codegen_flags: <defaults>
</compile_context>

<pallas_src>
import functools

import jax
import jax.numpy as jnp
from jax import lax
from jax.experimental import pallas as pl
from jax.experimental.pallas import tpu as pltpu

LANES = 128
CHUNK_M = 512          # rows per inner sub-chunk (keeps live ranges in vregs)
SMALL_TILE_M = 2048    # <= this many rows: single full-extent tile, no chunk loop


def _cdiv(a, b):
    return -(-a // b)


def _bce_terms(p, r):
    # PyTorch BCELoss clamps each log term at -100 for numerical safety.
    log_p = jnp.maximum(jnp.log(p), -100.0)
    log_1mp = jnp.maximum(jnp.log(1.0 - p), -100.0)
    # Positive form: r*log(p) + (1-r)*log(1-p) == log_1mp + r*(log_p - log_1mp).
    # The negation is folded into the scalar finalize outside the kernel.
    return log_1mp + r * (log_p - log_1mp)


def _fold8(x, rows):
    # (rows, 128) -> (8, 128): leading-axis sum preserves sublane/lane layout,
    # so it lowers to pure VPU vreg adds (no XLU traffic).
    return x.reshape(rows // 8, 8, LANES).sum(axis=0)


def _segloss_kernel(p_ref, r_ref, out_ref, *, tile_m, chunk_m, rows_total,
                    num_tiles, r_out, mask_tail):
    """Per-tile partial sums.

    p_ref/r_ref : (tile_m, 128) VMEM tiles (input dtype)
    out_ref     : (r_out, 3*128) f32 partial block: [bce | p*r | p+r]
    """
    if chunk_m is None:
        # ---- Small single-tile path: full-tile compute, no masking. ----
        p = p_ref[...].astype(jnp.float32)
        r = r_ref[...].astype(jnp.float32)
        bce = _bce_terms(p, r)
        if r_out == 8:
            out_ref[:, 0:LANES] = _fold8(bce, tile_m)
            out_ref[:, LANES:2 * LANES] = _fold8(p * r, tile_m)
            out_ref[:, 2 * LANES:3 * LANES] = _fold8(p + r, tile_m)
        else:
            # Tiny fallback (tile_m not a multiple of 8); XLU sum is fine here.
            out_ref[:, 0:LANES] = jnp.sum(bce, axis=0, keepdims=True)
            out_ref[:, LANES:2 * LANES] = jnp.sum(p * r, axis=0, keepdims=True)
            out_ref[:, 2 * LANES:3 * LANES] = jnp.sum(p + r, axis=0, keepdims=True)
        return

    # ---- Large chunked path. ----
    n_chunks = tile_m // chunk_m
    row0 = pl.program_id(0) * tile_m

    def tile_sums(do_mask):
        def body(c, carry):
            bce_acc, inter_acc, sum_acc = carry
            off = pl.multiple_of(c * chunk_m, chunk_m)
            p = p_ref[pl.ds(off, chunk_m), :].astype(jnp.float32)
            r = r_ref[pl.ds(off, chunk_m), :].astype(jnp.float32)
            if do_mask:
                # Zero invalid rows BEFORE the logs so stale/garbage VMEM in the
                # out-of-bounds block region cannot produce NaN/Inf.
                rows = (row0 + off +
                        lax.broadcasted_iota(jnp.int32, (chunk_m, LANES), 0))
                valid = rows < rows_total
                zero = jnp.zeros_like(p)
                p = jnp.where(valid, p, zero)
                r = jnp.where(valid, r, zero)
            bce_acc = bce_acc + _fold8(_bce_terms(p, r), chunk_m)
            inter_acc = inter_acc + _fold8(p * r, chunk_m)
            sum_acc = sum_acc + _fold8(p + r, chunk_m)
            return bce_acc, inter_acc, sum_acc

        zeros = jnp.zeros((8, LANES), jnp.float32)
        return lax.fori_loop(0, n_chunks, body, (zeros, zeros, zeros))

    if mask_tail:
        # Only the last tile contains invalid rows; gate the mask work so
        # every other tile runs the lean (mask-free) loop.
        is_last = pl.program_id(0) == num_tiles - 1
        bce_acc, inter_acc, sum_acc = lax.cond(
            is_last, lambda: tile_sums(True), lambda: tile_sums(False))
    else:
        bce_acc, inter_acc, sum_acc = tile_sums(False)

    out_ref[:, 0:LANES] = bce_acc
    out_ref[:, LANES:2 * LANES] = inter_acc
    out_ref[:, 2 * LANES:3 * LANES] = sum_acc


def seg_loss(pred_mask, real_mask):
    """Pallas implementation of SegLoss.forward.

    Returns (bce_loss, iou, loss) as float32 scalars.
    """
    assert pred_mask.shape == real_mask.shape
    total_n = pred_mask.size

    p_flat = pred_mask.reshape(-1)
    r_flat = real_mask.reshape(-1)

    # Only pad (with zeros, which contribute exactly 0 to every partial sum)
    # when numel is not a multiple of 128; typical mask shapes never hit this.
    rem = total_n % LANES
    if rem:
        pad = LANES - rem
        p_flat = jnp.pad(p_flat, (0, pad))
        r_flat = jnp.pad(r_flat, (0, pad))

    m_rows = p_flat.shape[0] // LANES
    p2d = p_flat.reshape(m_rows, LANES)
    r2d = r_flat.reshape(m_rows, LANES)

    itemsize = jnp.dtype(p2d.dtype).itemsize
    # ~4 MiB per input block regardless of dtype.
    max_tile_m = 8192 if itemsize >= 4 else 16384

    if m_rows <= SMALL_TILE_M:
        tile_m = m_rows            # full-extent block: always a legal shape
        chunk_m = None
        num_tiles = 1
        mask_tail = False
        r_out = 8 if tile_m % 8 == 0 else 1
    else:
        # Aim for >= 2 roughly-even tiles (keeps both v7x TensorCores busy)
        # while keeping tiles as large as VMEM comfortably allows.
        chunk_m = CHUNK_M
        tile_m = min(max_tile_m, chunk_m * _cdiv(_cdiv(m_rows, 2), chunk_m))
        num_tiles = _cdiv(m_rows, tile_m)
        mask_tail = (m_rows % tile_m) != 0
        r_out = 8

    kernel = functools.partial(
        _segloss_kernel, tile_m=tile_m, chunk_m=chunk_m, rows_total=m_rows,
        num_tiles=num_tiles, r_out=r_out, mask_tail=mask_tail)

    part_shape = jax.ShapeDtypeStruct((num_tiles * r_out, 3 * LANES), jnp.float32)
    in_spec = pl.BlockSpec((tile_m, LANES), lambda i: (i, 0))
    out_spec = pl.BlockSpec((r_out, 3 * LANES), lambda i: (i, 0))

    # 2 inputs x 2 pipeline buffers + headroom for in-kernel f32 temporaries.
    # Floor of 24 MiB overrides v5e's 16 MiB default scoped VMEM; cap of
    # 40 MiB stays well inside v7x's 64 MiB physical VMEM per TensorCore.
    block_bytes = tile_m * LANES * itemsize
    vmem_limit = min(max(6 * block_bytes + (4 << 20), 24 << 20), 40 << 20)

    parts = pl.pallas_call(
        kernel,
        out_shape=part_shape,
        grid_spec=pltpu.PrefetchScalarGridSpec(
            num_scalar_prefetch=0,
            grid=(num_tiles,),
            in_specs=[in_spec, in_spec],
            out_specs=out_spec,
        ),
        compiler_params=pltpu.CompilerParams(
            dimension_semantics=("parallel",),   # shards tiles across TCs on v7x
            vmem_limit_bytes=vmem_limit,
        ),
    )(p2d, r2d)

    # Tiny finalize over a few KB of partials in plain XLA.
    bce_sum = jnp.sum(parts[:, 0:LANES])
    inter_sum = jnp.sum(parts[:, LANES:2 * LANES])
    plus_sum = jnp.sum(parts[:, 2 * LANES:3 * LANES])

    bce_loss = -bce_sum / jnp.float32(total_n)   # negation folded here
    intersection = inter_sum + 1e-07
    union = plus_sum - intersection + 1e-07
    iou = intersection / union
    loss = bce_loss - iou + 1.0
    return bce_loss, iou, loss


def seg_loss_ref(pred_mask, real_mask):
    """Pure-JAX reference matching PyTorch semantics."""
    p = pred_mask.astype(jnp.float32)
    r = real_mask.astype(jnp.float32)
    log_p = jnp.maximum(jnp.log(p), -100.0)
    log_1mp = jnp.maximum(jnp.log(1.0 - p), -100.0)
    bce = jnp.mean(-(r * log_p + (1.0 - r) * log_1mp))
    intersection = jnp.sum(p * r) + 1e-07
    union = jnp.sum(p + r) - intersection + 1e-07
    iou = intersection / union
    loss = bce - iou + 1.0
    return bce, iou, loss


if __name__ == "__main__":
    key = jax.random.PRNGKey(0)
    k1, k2 = jax.random.split(key)

    B, C, H, W = 2, 4, 16, 16
    # pred_mask must be a probability in (0,1) for BCELoss.
    pred_mask = jax.nn.sigmoid(jax.random.normal(k1, (B, C, H, W), jnp.float32))
    # real_mask: hard 0/1 targets.
    real_mask = (jax.random.uniform(k2, (B, C, H, W)) > 0.5).astype(jnp.float32)

    bce, iou, loss = seg_loss(pred_mask, real_mask)
    jax.block_until_ready((bce, iou, loss))

    bce_r, iou_r, loss_r = seg_loss_ref(pred_mask, real_mask)
    assert jnp.allclose(bce, bce_r, rtol=1e-5, atol=1e-5), (bce, bce_r)
    assert jnp.allclose(iou, iou_r, rtol=1e-5, atol=1e-5), (iou, iou_r)
    assert jnp.allclose(loss, loss_r, rtol=1e-5, atol=1e-5), (loss, loss_r)

    print("KERNEL_OK")
</pallas_src>

<mosaic_0001>
module attributes {stable_mosaic.version = 11 : i64} {
  func.func @_segloss_kernel(%arg0: i32, %arg1: memref<16x128xf32, #tpu.memory_space<vmem>>, %arg2: memref<16x128xf32, #tpu.memory_space<vmem>>, %arg3: memref<8x384xf32, #tpu.memory_space<vmem>>) attributes {dimension_semantics = [#tpu.dimension_semantics<parallel>], iteration_bounds = array<i64: 1>, scalar_prefetch = 0 : i64, scratch_operands = 0 : i64, tpu.core_type = #tpu.core_type<tc>, window_params = [{transform_indices = @transform_0, window_bounds = array<i64: 16, 128>}, {transform_indices = @transform_1, window_bounds = array<i64: 16, 128>}, {transform_indices = @transform_2, window_bounds = array<i64: 8, 384>}]} {
    %c0 = arith.constant 0 : index
    %c0_0 = arith.constant 0 : index
    %0 = vector.load %arg1[%c0, %c0_0] : memref<16x128xf32, #tpu.memory_space<vmem>>, vector<16x128xf32>
    %c0_1 = arith.constant 0 : index
    %c0_2 = arith.constant 0 : index
    %1 = vector.load %arg2[%c0_1, %c0_2] : memref<16x128xf32, #tpu.memory_space<vmem>>, vector<16x128xf32>
    %2 = math.log %0 : vector<16x128xf32>
    %cst = arith.constant -1.000000e+02 : f32
    %3 = vector.broadcast %cst : f32 to vector<16x128xf32>
    %4 = arith.maximumf %2, %3 : vector<16x128xf32>
    %cst_3 = arith.constant 1.000000e+00 : f32
    %5 = vector.broadcast %cst_3 : f32 to vector<16x128xf32>
    %6 = arith.subf %5, %0 : vector<16x128xf32>
    %7 = math.log %6 : vector<16x128xf32>
    %cst_4 = arith.constant -1.000000e+02 : f32
    %8 = vector.broadcast %cst_4 : f32 to vector<16x128xf32>
    %9 = arith.maximumf %7, %8 : vector<16x128xf32>
    %10 = arith.subf %4, %9 : vector<16x128xf32>
    %11 = arith.mulf %1, %10 : vector<16x128xf32>
    %12 = arith.addf %9, %11 : vector<16x128xf32>
    %13 = vector.shape_cast %12 : vector<16x128xf32> to vector<2x8x128xf32>
    %cst_5 = arith.constant dense<0.000000e+00> : vector<8x128xf32>
    %14 = vector.multi_reduction <add>, %13, %cst_5 [0] : vector<2x8x128xf32> to vector<8x128xf32>
    %c0_6 = arith.constant 0 : index
    %c0_7 = arith.constant 0 : index
    %15 = vector.load %arg3[%c0_6, %c0_7] : memref<8x384xf32, #tpu.memory_space<vmem>>, vector<8x128xf32>
    tpu.vector_store %arg3[%c0_6, %c0_7], %14 {strides = array<i32>} : memref<8x384xf32, #tpu.memory_space<vmem>>, vector<8x128xf32>,
    %16 = arith.mulf %0, %1 : vector<16x128xf32>
    %17 = vector.shape_cast %16 : vector<16x128xf32> to vector<2x8x128xf32>
    %cst_8 = arith.constant dense<0.000000e+00> : vector<8x128xf32>
    %18 = vector.multi_reduction <add>, %17, %cst_8 [0] : vector<2x8x128xf32> to vector<8x128xf32>
    %c0_9 = arith.constant 0 : index
    %c128 = arith.constant 128 : index
    %19 = vector.load %arg3[%c0_9, %c128] : memref<8x384xf32, #tpu.memory_space<vmem>>, vector<8x128xf32>
    tpu.vector_store %arg3[%c0_9, %c128], %18 {strides = array<i32>} : memref<8x384xf32, #tpu.memory_space<vmem>>, vector<8x128xf32>,
    %20 = arith.addf %0, %1 : vector<16x128xf32>
    %21 = vector.shape_cast %20 : vector<16x128xf32> to vector<2x8x128xf32>
    %cst_10 = arith.constant dense<0.000000e+00> : vector<8x128xf32>
    %22 = vector.multi_reduction <add>, %21, %cst_10 [0] : vector<2x8x128xf32> to vector<8x128xf32>
    %c0_11 = arith.constant 0 : index
    %c256 = arith.constant 256 : index
    %23 = vector.load %arg3[%c0_11, %c256] : memref<8x384xf32, #tpu.memory_space<vmem>>, vector<8x128xf32>
    tpu.vector_store %arg3[%c0_11, %c256], %22 {strides = array<i32>} : memref<8x384xf32, #tpu.memory_space<vmem>>, vector<8x128xf32>,
    return
  }
  func.func @transform_0(%arg0: i32) -> (i32, i32) {
    %c0_i32 = arith.constant 0 : i32
    %c0_i32_0 = arith.constant 0 : i32
    return %arg0, %c0_i32 : i32, i32
  }
  func.func @transform_1(%arg0: i32) -> (i32, i32) {
    %c0_i32 = arith.constant 0 : i32
    %c0_i32_0 = arith.constant 0 : i32
    return %arg0, %c0_i32 : i32, i32
  }
  func.func @transform_2(%arg0: i32) -> (i32, i32) {
    %c0_i32 = arith.constant 0 : i32
    %c0_i32_0 = arith.constant 0 : i32
    return %arg0, %c0_i32 : i32, i32
  }
}

</mosaic_0001>

<bundles_post_ra>
// kernel: tpu_custom_call.1
= control target key start
LH: loop header
LB: loop body
LE: loop exit
PB: predicated region body
PF: predicated region fallthrough
CT: control target
= control target key end

     0   :  { %7 = vsyncpa [#allocation3], 0  ;;  %s198_s0 = inlined_call_operand.hbm [shape: f32[16,128], index: 0, kind: input, shape index: {}]   ;;  %s199_s1 = inlined_call_operand.hbm [shape: f32[16,128], index: 1, kind: input, shape index: {}]   ;;  %s200_s2 = inlined_call_operand.hbm [shape: f32[8,384], index: 2, kind: output, shape index: {}]  }
   0x1   :  { %8 = vsyncpa [#allocation6], 0 }
   0x2   :  { %9 = vsyncpa [#allocation4], 0  ;;  %s169_s9 = smov [#allocation2]  }
   0x3   :  { %s15_s10 = sshll.u32 %s169_s9, 4  ;;  %s16_s10 = int_to_ptr.vmem [resolvable:$true] %s15_s10 }
   0x4   :  { %s111_s11 = scalar_lea.vmem %s16_s10, 256  ;;  %p116_p1 = scmp.lt.s32.totalorder %s16_s10, %s16_s10 }
   0x5   :  { %p112_p0 = scmp.ne.s32.totalorder %s16_s10, %s111_s11  ;;  %p117_p2 = scmp.lt.s32.totalorder %s111_s11, %s111_s11 }
   0x7   :  { %p118_p3 = por %p117_p2, %p116_p1 }
   0x9   :  { %p119_p4 = pnand %p118_p3, %p112_p0 }
   0xb   :  { %122 = shalt.err (!%p119_p4)
}
   0xc   :  { %s170_s12 = smov 128   ;;  %s171_s13 = smov 8  }
   0xd   :  { %21 = dma.hbm_to_vmem [thread:$0]  %s198_s0, 256, %s16_s10, [#allocation3], %s170_s12, %s170_s12, %s171_s13  }
   0xe   :  { %s172_s16 = smov [#allocation5]  }
   0xf   :  { %s27_s17 = sshll.u32 %s172_s16, 4  ;;  %s28_s17 = int_to_ptr.vmem [resolvable:$true] %s27_s17 }
  0x10   :  { %s131_s18 = scalar_lea.vmem %s28_s17, 256  ;;  %p136_p6 = scmp.lt.s32.totalorder %s28_s17, %s28_s17 }
  0x11   :  { %p132_p5 = scmp.ne.s32.totalorder %s28_s17, %s131_s18  ;;  %p137_p7 = scmp.lt.s32.totalorder %s131_s18, %s131_s18 }
  0x13   :  { %p138_p8 = por %p137_p7, %p136_p6 }
  0x15   :  { %p139_p9 = pnand %p138_p8, %p132_p5 }
  0x17   :  { %142 = shalt.err (!%p139_p9)
}
  0x18   :  { %33 = dma.hbm_to_vmem [thread:$0]  %s199_s1, 256, %s28_s17, [#allocation6], %s170_s12, %s170_s12, %s171_s13  }
  0x19   :  { %163 = dma.done.wait [#allocation3], 256  }
  0x1a   :  { %164 = vsyncadd [#allocation3], 4294967040 }
  0x1b   :  { %165 = dma.done.wait [#allocation6], 256  }
  0x1c   :  { %166 = vsyncadd [#allocation6], 4294967040  ;;  %v40_v0 = vld [vmem:[#allocation2] sm:$0xff]  ;;  %v41_v1 = vld [vmem:[#allocation2 + $0x8] sm:$0xff]  ;;  %s173_s0 = smov [#allocation7]  }
  0x1d   :  { %v42_v2 = vld [vmem:[#allocation5] sm:$0xff]  ;;  %v43_v3 = vld [vmem:[#allocation5 + $0x8] sm:$0xff]  ;;  %95 = vlog2.f32 %v40_v0  ;;  %v50_v4 = vsub.f32 1.0, %v40_v0  ;;  %v51_v5 = vsub.f32 1.0, %v41_v1  ;;  %s80_s1 = sshll.u32 %s173_s0, 4  ;;  %s81_s1 = int_to_ptr.vmem [resolvable:$true] %s80_s1 }
  0x1e   :  { %v66_v6 = vmul.f32 %v42_v2, %v40_v0  ;;  %97 = vlog2.f32 %v41_v1  ;;  %v67_v7 = vmul.f32 %v43_v3, %v41_v1  ;;  %v70_v8 = vadd.f32 %v42_v2, %v40_v0  ;;  %s143_s21 = scalar_lea.vmem %s81_s1, 384  ;;  %p148_p11 = scmp.lt.s32.totalorder %s81_s1, %s81_s1 }
  0x1f   :  { %v71_v9 = vadd.f32 %v43_v3, %v41_v1  ;;  %99 = vlog2.f32 %v50_v4  ;;  %p144_p10 = scmp.ne.s32.totalorder %s81_s1, %s143_s21  ;;  %p149_p12 = scmp.lt.s32.totalorder %s143_s21, %s143_s21 }
  0x20   :  { %101 = vlog2.f32 %v51_v5  ;;  %v68_v10 = vadd.f32 %v67_v7, %v66_v6 }
  0x21   :  { %v72_v11 = vadd.f32 %v71_v9, %v70_v8  ;;  %p150_p13 = por %p149_p12, %p148_p11 }
  0x22   :  { %69 = vst [vmem:[#allocation7 + $0x8] sm:$0xff] %v68_v10 }
  0x23   :  { %73 = vst [vmem:[#allocation7 + $0x10] sm:$0xff] %v72_v11  ;;  %p151_p0 = pnand %p150_p13, %p144_p10 }
  0x2a   :  { %v96_v12 = vpop.eup %95 }
  0x2b   :  { %v98_v13 = vpop.eup %97  ;;  %v45_v14 = vmul.f32 0.6931472, %v96_v12 }
  0x2c   :  { %v100_v15 = vpop.eup %99  ;;  %v47_v16 = vmul.f32 0.6931472, %v98_v13 }
  0x2d   :  { %v102_v17 = vpop.eup %101  ;;  %v48_v18 = vmax.f32 %v45_v14, -100.0  ;;  %v53_v19 = vmul.f32 0.6931472, %v100_v15 }
  0x2e   :  { %v49_v20 = vmax.f32 %v47_v16, -100.0  ;;  %v55_v21 = vmul.f32 0.6931472, %v102_v17 }
  0x2f   :  { %v56_v22 = vmax.f32 %v53_v19, -100.0 }
  0x30   :  { %v57_v23 = vmax.f32 %v55_v21, -100.0 }
  0x31   :  { %v58_v24 = vsub.f32 %v48_v18, %v56_v22 }
  0x32   :  { %v59_v25 = vsub.f32 %v49_v20, %v57_v23 }
  0x33   :  { %v60_v26 = vmul.f32 %v58_v24, %v42_v2 }
  0x34   :  { %v61_v27 = vmul.f32 %v59_v25, %v43_v3 }
  0x35   :  { %v62_v28 = vadd.f32 %v60_v26, %v56_v22 }
  0x36   :  { %v63_v29 = vadd.f32 %v61_v27, %v57_v23 }
  0x38   :  { %v64_v30 = vadd.f32 %v63_v29, %v62_v28 }
  0x3a   :  { %65 = vst [vmem:[#allocation7] sm:$0xff] %v64_v30 }
  0x3b   :  { %154 = shalt.err (!%p151_p0)
}
  0x3c   :  { %83 = dma.vmem_to_hbm [thread:$0]  %s81_s1, 384, %s200_s2, [#allocation4]  }
  0x3d   :  { %167 = dma.done.wait [#allocation4], 384  }
  0x3e   :  { %168 = vsyncadd [#allocation4], 4294966912 }
  0x3f   :  { %87 = vsyncpa [#allocation3], 1 }
  0x40   :  { %88 = vsyncpa [#allocation6], 1 }
  0x41   :  { %89 = vsyncpa [#allocation4], 1 }

</bundles_post_ra>
